<compile_context>
chip_gen: v7x
topology: tpu7x:2x2x1
jax: 0.10.0
libtpu: 0.0.40
codegen_flags: <defaults>
</compile_context>

<pallas_src>
import functools
import math

import jax
import jax.numpy as jnp
from jax.experimental import pallas as pl
from jax.experimental.pallas import tpu as pltpu


def _pad_axis_kernel(x_ref, o_ref, *, lo_cols, copy_cols, value):
    rows = o_ref.shape[0]
    # Interior copy: one contiguous store of the whole input tile.
    # (lo_cols == 0 for the GBST use-case, so this store starts lane-aligned.)
    o_ref[:, lo_cols:lo_cols + copy_cols] = x_ref[...]
    # Fill only the pad regions that exist (static, trace-time conditionals).
    if lo_cols > 0:
        o_ref[:, :lo_cols] = jnp.full((rows, lo_cols), value, dtype=o_ref.dtype)
    hi_cols = o_ref.shape[1] - lo_cols - copy_cols
    if hi_cols > 0:
        o_ref[:, lo_cols + copy_cols:] = jnp.full(
            (rows, hi_cols), value, dtype=o_ref.dtype)


def _choose_row_tile(n_rows, row_bytes, budget_bytes=6 * 1024 * 1024):
    """Rows per tile so that double-buffered (in + out) tiles ~<= 2*budget."""
    tr = max(1, budget_bytes // max(row_bytes, 1))
    if tr >= n_rows:
        return n_rows                       # full dim: always a legal block
    if tr >= 8:
        return (tr // 8) * 8                # keep 2nd-minor dim a sublane mult
    # Extremely wide rows: keep a legal (multiple-of-8) block even if it
    # slightly exceeds the soft budget.
    # TODO(synk): add column tiling for rows wider than the VMEM budget.
    return min(8, n_rows)


def _pad_axis_2d(x2, lo_cols, hi_cols, value):
    """Pad the flattened-trailing axis of a 2D view with a constant."""
    n_rows, c_in = x2.shape
    c_out = c_in + lo_cols + hi_cols
    itemsize = jnp.dtype(x2.dtype).itemsize
    row_bytes = (c_in + c_out) * itemsize
    tr = _choose_row_tile(n_rows, row_bytes)

    kernel = functools.partial(
        _pad_axis_kernel, lo_cols=lo_cols, copy_cols=c_in, value=value)

    return pl.pallas_call(
        kernel,
        out_shape=jax.ShapeDtypeStruct((n_rows, c_out), x2.dtype),
        grid=(pl.cdiv(n_rows, tr),),
        in_specs=[pl.BlockSpec((tr, c_in), lambda i: (i, 0))],
        out_specs=pl.BlockSpec((tr, c_out), lambda i: (i, 0)),
        compiler_params=pltpu.CompilerParams(
            dimension_semantics=("parallel",),
            vmem_limit_bytes=32 * 1024 * 1024,
        ),
    )(x2)


def pallas_pad(x, padding, value=0.0):
    """Constant-pad `x` with PyTorch F.pad padding convention."""
    ndim = x.ndim
    assert len(padding) % 2 == 0
    npad = len(padding) // 2
    assert npad <= ndim

    lo = [0] * ndim
    hi = [0] * ndim
    for i in range(npad):
        d = ndim - 1 - i                    # padding pairs start at last dim
        lo[d] = int(padding[2 * i])
        hi[d] = int(padding[2 * i + 1])

    # Negative padding == cropping (F.pad semantics): crop up-front, then the
    # Pallas path only sees non-negative pads.
    if any(p < 0 for p in lo + hi):
        idx = []
        for d in range(ndim):
            start = -lo[d] if lo[d] < 0 else 0
            stop = x.shape[d] + hi[d] if hi[d] < 0 else x.shape[d]
            idx.append(slice(start, stop))
        x = x[tuple(idx)]
        lo = [max(p, 0) for p in lo]
        hi = [max(p, 0) for p in hi]

    # Apply one padded axis at a time (last axis first).  Constant padding is
    # axis-separable; GBST only ever pads a single axis, so this is one pass.
    out = x
    for d in reversed(range(ndim)):
        if lo[d] == 0 and hi[d] == 0:
            continue
        shape = out.shape
        n_rows = math.prod(shape[:d])
        inner = math.prod(shape[d + 1:])
        c_in = shape[d] * inner
        out2 = _pad_axis_2d(out.reshape(n_rows, c_in),
                            lo[d] * inner, hi[d] * inner, value)
        out = out2.reshape(shape[:d] + (shape[d] + lo[d] + hi[d],) + shape[d + 1:])
    return out


if __name__ == "__main__":
    key = jax.random.PRNGKey(0)

    # GBST-style usage: pad the sequence axis on the right by block_size - 1.
    B, S, D = 2, 8, 32
    block_size = 4
    padding = (0, 0, 0, block_size - 1)     # (D_lo, D_hi, S_lo, S_hi)
    value = 0.0

    x = jax.random.normal(key, (B, S, D), dtype=jnp.float32)

    out = jax.block_until_ready(pallas_pad(x, padding, value=value))
    ref = jnp.pad(x, ((0, 0), (0, block_size - 1), (0, 0)),
                  mode="constant", constant_values=value)
    assert out.shape == (B, S + block_size - 1, D), out.shape
    assert jnp.array_equal(out, ref), "mismatch vs reference pad (GBST case)"

    # General-path check: multi-axis pad, nonzero lo pad, non-zero value.
    padding2 = (1, 2, 0, 3)                 # D_lo=1, D_hi=2, S_hi=3
    out2 = jax.block_until_ready(pallas_pad(x, padding2, value=-1.0))
    ref2 = jnp.pad(x, ((0, 0), (0, 3), (1, 2)),
                   mode="constant", constant_values=-1.0)
    assert out2.shape == ref2.shape, out2.shape
    assert jnp.array_equal(out2, ref2), "mismatch vs reference pad (general)"

    # Negative-pad (cropping) check, pure wrapper-side slicing + pad.
    padding3 = (0, 0, -2, 1)                # crop 2 rows of S at front, pad 1
    out3 = jax.block_until_ready(pallas_pad(x, padding3, value=0.0))
    ref3 = jnp.pad(x[:, 2:, :], ((0, 0), (0, 1), (0, 0)), mode="constant")
    assert jnp.array_equal(out3, ref3), "mismatch vs reference pad (negative)"

    print("KERNEL_OK")
</pallas_src>

<mosaic_0001>
module attributes {stable_mosaic.version = 11 : i64} {
  func.func @_pad_axis_kernel(%arg0: i32, %arg1: memref<2x256xf32, #tpu.memory_space<vmem>>, %arg2: memref<2x352xf32, #tpu.memory_space<vmem>>) attributes {dimension_semantics = [#tpu.dimension_semantics<parallel>], iteration_bounds = array<i64: 1>, scalar_prefetch = 0 : i64, scratch_operands = 0 : i64, tpu.core_type = #tpu.core_type<tc>, window_params = [{transform_indices = @transform_0, window_bounds = array<i64: 2, 256>}, {transform_indices = @transform_1, window_bounds = array<i64: 2, 352>}]} {
    %c0 = arith.constant 0 : index
    %c0_0 = arith.constant 0 : index
    %0 = vector.load %arg1[%c0, %c0_0] : memref<2x256xf32, #tpu.memory_space<vmem>>, vector<2x256xf32>
    %c0_1 = arith.constant 0 : index
    %c0_2 = arith.constant 0 : index
    %1 = vector.load %arg2[%c0_1, %c0_2] : memref<2x352xf32, #tpu.memory_space<vmem>>, vector<2x256xf32>
    tpu.vector_store %arg2[%c0_1, %c0_2], %0 {strides = array<i32>} : memref<2x352xf32, #tpu.memory_space<vmem>>, vector<2x256xf32>,
    %cst = arith.constant 0.000000e+00 : f32
    %2 = vector.broadcast %cst : f32 to vector<2x96xf32>
    %c0_3 = arith.constant 0 : index
    %c256 = arith.constant 256 : index
    %3 = vector.load %arg2[%c0_3, %c256] : memref<2x352xf32, #tpu.memory_space<vmem>>, vector<2x96xf32>
    tpu.vector_store %arg2[%c0_3, %c256], %2 {strides = array<i32>} : memref<2x352xf32, #tpu.memory_space<vmem>>, vector<2x96xf32>,
    return
  }
  func.func @transform_0(%arg0: i32) -> (i32, i32) {
    %c0_i32 = arith.constant 0 : i32
    %c0_i32_0 = arith.constant 0 : i32
    return %arg0, %c0_i32 : i32, i32
  }
  func.func @transform_1(%arg0: i32) -> (i32, i32) {
    %c0_i32 = arith.constant 0 : i32
    %c0_i32_0 = arith.constant 0 : i32
    return %arg0, %c0_i32 : i32, i32
  }
}

</mosaic_0001>

<bundles_post_ra>
// kernel: tpu_custom_call.1
= control target key start
LH: loop header
LB: loop body
LE: loop exit
PB: predicated region body
PF: predicated region fallthrough
CT: control target
= control target key end

     0   :  { %6 = vsyncpa [#allocation3], 0  ;;  %s128_s0 = inlined_call_operand.hbm [shape: f32[2,256], index: 0, kind: input, shape index: {}]   ;;  %s129_s1 = inlined_call_operand.hbm [shape: f32[2,352], index: 1, kind: output, shape index: {}]  }
   0x1   :  { %7 = vsyncpa [#allocation4], 0  ;;  %s91_s6 = smov [#allocation2]   ;;  %s43_s10 = scalar_lea.hbm %s128_s0, 64 }
   0x2   :  { %s14_s7 = sshll.u32 %s91_s6, 4  ;;  %p44_p0 = scmp.ne.s32.totalorder %s128_s0, %s43_s10  ;;  %s15_s7 = int_to_ptr.vmem [resolvable:$true] %s14_s7 }
   0x3   :  { %p47_p1 = scmp.lt.u32.totalorder %s43_s10, %s128_s0 }
   0x5   :  { %p49_p2 = pnand %p47_p1, %p44_p0 }
   0x7   :  { %52 = shalt.err (!%p49_p2)
}
   0x8   :  { %s53_s15 = scalar_lea.vmem %s15_s7, 64  ;;  %p58_p4 = scmp.lt.s32.totalorder %s15_s7, %s15_s7 }
   0x9   :  { %p54_p3 = scmp.ne.s32.totalorder %s15_s7, %s53_s15  ;;  %p59_p5 = scmp.lt.s32.totalorder %s53_s15, %s53_s15 }
   0xb   :  { %p60_p6 = por %p59_p5, %p58_p4 }
   0xd   :  { %p61_p7 = pnand %p60_p6, %p54_p3 }
   0xf   :  { %64 = shalt.err (!%p61_p7)
}
  0x10   :  { %17 = dma.hbm_to_vmem [thread:$0]  %s128_s0, 64, %s15_s7, [#allocation3]  }
  0x11   :  { %87 = dma.done.wait [#allocation3], 64  }
  0x12   :  { %88 = vsyncadd [#allocation3], 4294967232  ;;  %vm23_vm0 = vcmask 779264   ;;  %v92_v0 = vmov 0.0   ;;  %s93_s18 = smov [#allocation5]  }
  0x13   :  { %24 = vst.msk [vmem:[#allocation5 + $0x4] sm:$0x3] %vm23_vm0, %v92_v0  ;;  %s31_s19 = sshll.u32 %s93_s18, 4  ;;  %v21_v1 = vld [vmem:[#allocation2] sm:$0xf]  ;;  %s32_s19 = int_to_ptr.vmem [resolvable:$true] %s31_s19 }
  0x14   :  { %22 = vst [vmem:[#allocation5] sm:$0xf] %v21_v1  ;;  %s65_s20 = scalar_lea.vmem %s32_s19, 96  ;;  %p70_p9 = scmp.lt.s32.totalorder %s32_s19, %s32_s19 }
  0x15   :  { %p66_p8 = scmp.ne.s32.totalorder %s32_s19, %s65_s20  ;;  %p71_p10 = scmp.lt.s32.totalorder %s65_s20, %s65_s20 }
  0x17   :  { %p72_p11 = por %p71_p10, %p70_p9 }
  0x19   :  { %p73_p12 = pnand %p72_p11, %p66_p8 }
  0x1b   :  { %76 = shalt.err (!%p73_p12)
}
  0x1c   :  { %s77_s0 = scalar_lea.hbm %s129_s1, 96 }
  0x1d   :  { %p78_p13 = scmp.ne.s32.totalorder %s129_s1, %s77_s0  ;;  %p81_p0 = scmp.lt.u32.totalorder %s77_s0, %s129_s1 }
  0x1f   :  { %p83_p1 = pnand %p81_p0, %p78_p13 }
  0x21   :  { %86 = shalt.err (!%p83_p1)
}
  0x22   :  { %34 = dma.vmem_to_hbm [thread:$0]  %s32_s19, 96, %s129_s1, [#allocation4]  }
  0x23   :  { %89 = dma.done.wait [#allocation4], 96  }
  0x24   :  { %90 = vsyncadd [#allocation4], 4294967200 }
  0x25   :  { %38 = vsyncpa [#allocation3], 1 }
  0x26   :  { %39 = vsyncpa [#allocation4], 1 }

</bundles_post_ra>
